<compile_context>
chip_gen: v6e
topology: v6e:2x2x1
jax: 0.10.0
libtpu: 0.0.40
codegen_flags: <defaults>
</compile_context>

<pallas_src>
import functools

import jax
import jax.numpy as jnp
from jax import lax
from jax.experimental import pallas as pl
from jax.experimental.pallas import tpu as pltpu


_LN_EPS = 1e-5                    # PyTorch nn.LayerNorm default
_ACT_DTYPE = jnp.bfloat16         # activation / weight storage dtype (MXU native)

# sublane-axis tiles must be multiples of 8 (or full dim); lane-axis tiles
# must be multiples of 128 (or full dim).  256-multiples first for v6e/v7x.
_M_TILES = (512, 256, 128, 64, 32, 16, 8)
_LANE_TILES = (512, 256, 128)


def _pick_tile(dim, candidates):
    for c in candidates:
        if dim >= c and dim % c == 0:
            return c
    return dim   # full-dim block is always legal


_VMEM_LIMIT_CACHE = None


def _vmem_limit():
    """~65% of physical VMEM; conservative fallback fits v7x's 64 MiB/TC."""
    global _VMEM_LIMIT_CACHE
    if _VMEM_LIMIT_CACHE is None:
        try:
            cap = pltpu.get_tpu_info().vmem_capacity_bytes
        except Exception:
            cap = 64 * 1024 * 1024
        _VMEM_LIMIT_CACHE = int(cap * 0.65)
    return _VMEM_LIMIT_CACHE


# ------------------- single-buffering of constant blocks ---------------------

_SINGLE_BUFFER_OK = None


def _probe_copy_kernel(x_ref, o_ref):
    o_ref[...] = x_ref[...]


def _single_buffer_supported():
    """Probe whether pipeline_mode=pl.Buffered(1) lowers on this backend."""
    global _SINGLE_BUFFER_OK
    if _SINGLE_BUFFER_OK is None:
        try:
            fn = pl.pallas_call(
                _probe_copy_kernel,
                grid=(1,),
                in_specs=[pl.BlockSpec((8, 128), lambda i: (0, 0),
                                       pipeline_mode=pl.Buffered(1))],
                out_specs=pl.BlockSpec((8, 128), lambda i: (0, 0)),
                out_shape=jax.ShapeDtypeStruct((8, 128), jnp.float32))
            jax.block_until_ready(fn(jnp.zeros((8, 128), jnp.float32)))
            _SINGLE_BUFFER_OK = True
        except Exception:
            _SINGLE_BUFFER_OK = False
    return _SINGLE_BUFFER_OK


def _spec(shape, index_map, single_buffer=False):
    """BlockSpec; (near-)constant blocks are single-buffered when supported
    (default 2-deep buffering only doubles their VMEM cost)."""
    if single_buffer and _single_buffer_supported():
        return pl.BlockSpec(shape, index_map, pipeline_mode=pl.Buffered(1))
    return pl.BlockSpec(shape, index_map)


# ----------------------------- tiled linear ---------------------------------

def _linear_kernel(*refs, activation, has_residual):
    if has_residual:
        x_ref, w_ref, b_ref, r_ref, o_ref, acc_ref = refs
    else:
        x_ref, w_ref, b_ref, o_ref, acc_ref = refs
        r_ref = None

    k = pl.program_id(2)

    @pl.when(k == 0)
    def _():
        acc_ref[...] = jnp.zeros_like(acc_ref)

    acc_ref[...] += jnp.dot(x_ref[...].astype(jnp.bfloat16),
                            w_ref[...].astype(jnp.bfloat16),
                            preferred_element_type=jnp.float32)

    @pl.when(k == pl.num_programs(2) - 1)
    def _():
        y = acc_ref[...] + b_ref[...].astype(jnp.float32)
        if activation == "gelu":
            # TODO(synk): PyTorch nn.GELU() defaults to the exact erf form; the
            # tanh approximation is used here for a TPU-friendly lowering.
            y = jax.nn.gelu(y, approximate=True)
        if r_ref is not None:
            y = y + r_ref[...].astype(jnp.float32)
        o_ref[...] = y.astype(o_ref.dtype)


def linear(x, w, b, *, activation=None, residual=None):
    """y = x @ w + b (+ optional gelu, + optional residual), tiled over M/N/K,
    bf16 MXU operands, f32 accumulation."""
    m, kdim = x.shape
    n = w.shape[1]
    tm = _pick_tile(m, _M_TILES)
    tn = _pick_tile(n, _LANE_TILES)
    tk = _pick_tile(kdim, _LANE_TILES)
    grid = (m // tm, n // tn, kdim // tk)

    in_specs = [
        pl.BlockSpec((tm, tk), lambda i, j, k: (i, k)),
        pl.BlockSpec((tk, tn), lambda i, j, k: (k, j)),
        _spec((1, tn), lambda i, j, k: (0, j), single_buffer=True),
    ]
    args = [x, w, b.reshape(1, n)]
    if residual is not None:
        # only read at the last K step -> keep a single VMEM buffer
        in_specs.append(_spec((tm, tn), lambda i, j, k: (i, j),
                              single_buffer=True))
        args.append(residual)

    bytes_accessed = 2 * (m * kdim + kdim * n + m * n) + 4 * n
    if residual is not None:
        bytes_accessed += 2 * m * n
    return pl.pallas_call(
        functools.partial(_linear_kernel, activation=activation,
                          has_residual=residual is not None),
        grid=grid,
        in_specs=in_specs,
        out_specs=pl.BlockSpec((tm, tn), lambda i, j, k: (i, j)),
        out_shape=jax.ShapeDtypeStruct((m, n), x.dtype),
        scratch_shapes=[pltpu.VMEM((tm, tn), jnp.float32)],
        compiler_params=pltpu.CompilerParams(
            dimension_semantics=("parallel", "parallel", "arbitrary"),
            vmem_limit_bytes=_vmem_limit()),
        cost_estimate=pl.CostEstimate(
            flops=2 * m * n * kdim,
            transcendentals=(m * n if activation == "gelu" else 0),
            bytes_accessed=bytes_accessed),
    )(*args)


# ------------------------ fused LayerNorm + linear ---------------------------

def _ln_linear_kernel(x_ref, g_ref, bln_ref, w_ref, b_ref, o_ref, h_sc, *,
                      activation):
    j = pl.program_id(1)

    # LayerNorm of the resident (tm, d) row block is computed once per row
    # block (j == 0) and cached in VMEM for all remaining N tiles.
    @pl.when(j == 0)
    def _():
        x = x_ref[...].astype(jnp.float32)
        mu = jnp.mean(x, axis=-1, keepdims=True)
        var = jnp.mean(jnp.square(x - mu), axis=-1, keepdims=True)
        h = (x - mu) * lax.rsqrt(var + _LN_EPS)
        h = h * g_ref[...].astype(jnp.float32) + bln_ref[...].astype(jnp.float32)
        h_sc[...] = h.astype(h_sc.dtype)

    y = jnp.dot(h_sc[...], w_ref[...].astype(jnp.bfloat16),
                preferred_element_type=jnp.float32)
    y = y + b_ref[...].astype(jnp.float32)
    if activation == "gelu":
        y = jax.nn.gelu(y, approximate=True)
    o_ref[...] = y.astype(o_ref.dtype)


def ln_linear(x, g, bln, w, b, *, activation=None):
    """y = LayerNorm(x) @ w + b, LN fused and cached across the N tiles."""
    m, d = x.shape
    n = w.shape[1]
    tm = _pick_tile(m, _M_TILES)
    tn = _pick_tile(n, _LANE_TILES)
    grid = (m // tm, n // tn)
    return pl.pallas_call(
        functools.partial(_ln_linear_kernel, activation=activation),
        grid=grid,
        in_specs=[
            pl.BlockSpec((tm, d), lambda i, j: (i, 0)),
            _spec((1, d), lambda i, j: (0, 0), single_buffer=True),
            _spec((1, d), lambda i, j: (0, 0), single_buffer=True),
            pl.BlockSpec((d, tn), lambda i, j: (0, j)),
            _spec((1, tn), lambda i, j: (0, j), single_buffer=True),
        ],
        out_specs=pl.BlockSpec((tm, tn), lambda i, j: (i, j)),
        out_shape=jax.ShapeDtypeStruct((m, n), x.dtype),
        scratch_shapes=[pltpu.VMEM((tm, d), jnp.bfloat16)],
        compiler_params=pltpu.CompilerParams(
            dimension_semantics=("parallel", "arbitrary"),
            vmem_limit_bytes=_vmem_limit()),
        cost_estimate=pl.CostEstimate(
            flops=2 * m * n * d + 8 * m * d,
            transcendentals=m + (m * n if activation == "gelu" else 0),
            bytes_accessed=2 * (m * d + d * n + m * n) + 4 * (2 * d + n)),
    )(x, g.reshape(1, d), bln.reshape(1, d), w, b.reshape(1, n))


# ----- fused MLP sub-block: LN -> fc1 -> GELU -> fc2 -> +res, hid-chunked ----

def _mlp_block_kernel(x_ref, g_ref, bln_ref, w1_ref, b1_ref, w2_ref, b2_ref,
                      o_ref, h_sc, acc_ref):
    c = pl.program_id(1)

    @pl.when(c == 0)
    def _():
        x = x_ref[...].astype(jnp.float32)
        mu = jnp.mean(x, axis=-1, keepdims=True)
        var = jnp.mean(jnp.square(x - mu), axis=-1, keepdims=True)
        h = (x - mu) * lax.rsqrt(var + _LN_EPS)
        h = h * g_ref[...].astype(jnp.float32) + bln_ref[...].astype(jnp.float32)
        h_sc[...] = h.astype(h_sc.dtype)
        acc_ref[...] = jnp.zeros_like(acc_ref)

    t = jnp.dot(h_sc[...], w1_ref[...].astype(jnp.bfloat16),
                preferred_element_type=jnp.float32)
    t = t + b1_ref[...].astype(jnp.float32)
    t = jax.nn.gelu(t, approximate=True)
    acc_ref[...] += jnp.dot(t.astype(jnp.bfloat16),
                            w2_ref[...].astype(jnp.bfloat16),
                            preferred_element_type=jnp.float32)

    @pl.when(c == pl.num_programs(1) - 1)
    def _():
        y = (acc_ref[...] + b2_ref[...].astype(jnp.float32)
             + x_ref[...].astype(jnp.float32))      # residual = pre-LN input
        o_ref[...] = y.astype(o_ref.dtype)


def mlp_block(x, g, bln, w1, b1, w2, b2):
    """LN -> fc1 -> GELU -> fc2 -> +residual, streamed over hidden-dim chunks
    so only (d, tc)/(tc, d) weight tiles and a (tm, d) f32 accumulator are
    ever resident in VMEM."""
    m, d = x.shape
    hid = w1.shape[1]
    tm = _pick_tile(m, _M_TILES)
    tc = _pick_tile(hid, _LANE_TILES)
    grid = (m // tm, hid // tc)
    return pl.pallas_call(
        _mlp_block_kernel,
        grid=grid,
        in_specs=[
            pl.BlockSpec((tm, d), lambda i, c: (i, 0)),
            _spec((1, d), lambda i, c: (0, 0), single_buffer=True),
            _spec((1, d), lambda i, c: (0, 0), single_buffer=True),
            pl.BlockSpec((d, tc), lambda i, c: (0, c)),
            pl.BlockSpec((1, tc), lambda i, c: (0, c)),
            pl.BlockSpec((tc, d), lambda i, c: (c, 0)),
            _spec((1, d), lambda i, c: (0, 0), single_buffer=True),
        ],
        out_specs=pl.BlockSpec((tm, d), lambda i, c: (i, 0)),
        out_shape=jax.ShapeDtypeStruct((m, d), x.dtype),
        scratch_shapes=[pltpu.VMEM((tm, d), jnp.bfloat16),
                        pltpu.VMEM((tm, d), jnp.float32)],
        compiler_params=pltpu.CompilerParams(
            dimension_semantics=("parallel", "arbitrary"),
            vmem_limit_bytes=_vmem_limit()),
        cost_estimate=pl.CostEstimate(
            flops=4 * m * d * hid,
            transcendentals=m + m * hid,
            bytes_accessed=2 * (2 * m * d + 2 * d * hid) + 4 * (3 * d + hid)),
    )(x, g.reshape(1, d), bln.reshape(1, d), w1, b1.reshape(1, hid),
      w2, b2.reshape(1, d))


# ----------------------- flash-style MHSA kernel -----------------------------

def _flash_attn_kernel(q_ref, k_ref, v_ref, o_ref, q_sc, m_sc, l_sc, acc_sc, *,
                       scale, seq_len, kv_tile):
    kv = pl.program_id(1)

    @pl.when(kv == 0)
    def _():
        # scale folded into q once per (batch, head)
        q_sc[...] = (q_ref[0].astype(jnp.float32) * scale).astype(q_sc.dtype)
        m_sc[...] = jnp.full(m_sc.shape, -jnp.inf, m_sc.dtype)
        l_sc[...] = jnp.zeros_like(l_sc)
        acc_sc[...] = jnp.zeros_like(acc_sc)

    k = k_ref[0]                                   # [kv_tile, dh] bf16
    v = v_ref[0]
    s = lax.dot_general(q_sc[...], k, (((1,), (1,)), ((), ())),
                        preferred_element_type=jnp.float32)   # [S_pad, kv_tile]
    # mask zero-padded keys
    col = lax.broadcasted_iota(jnp.int32, s.shape, 1) + kv * kv_tile
    s = jnp.where(col < seq_len, s, -1e30)

    m_prev = m_sc[...]
    m_new = jnp.maximum(m_prev, jnp.max(s, axis=-1, keepdims=True))
    alpha = jnp.exp(m_prev - m_new)
    p = jnp.exp(s - m_new)
    l_sc[...] = alpha * l_sc[...] + jnp.sum(p, axis=-1, keepdims=True)
    acc_sc[...] = alpha * acc_sc[...] + jnp.dot(
        p.astype(jnp.bfloat16), v, preferred_element_type=jnp.float32)
    m_sc[...] = m_new

    @pl.when(kv == pl.num_programs(1) - 1)
    def _():
        o_ref[0] = (acc_sc[...] *
                    pl.reciprocal(l_sc[...], approx=True)).astype(o_ref.dtype)


def attention(qkv, batch, num_heads):
    """softmax(q k^T / sqrt(dh)) v, heads in the grid, online softmax over
    kv tiles.  qkv: [B*S, 3*D] packed (3, heads, head_dim) along features.
    Returns [B*S, D]."""
    bs, three_d = qkv.shape
    s = bs // batch
    d = three_d // 3
    dh = d // num_heads
    scale = 1.0 / float(dh) ** 0.5

    # wrapper-side layout plumbing: per-head lane-dense q/k/v, padded sequence
    qkv = qkv.reshape(batch, s, 3, num_heads, dh)
    qkv = jnp.transpose(qkv, (2, 0, 3, 1, 4)).reshape(3, batch * num_heads, s, dh)
    s_pad = ((s + 127) // 128) * 128
    if s_pad != s:
        qkv = jnp.pad(qkv, ((0, 0), (0, 0), (0, s_pad - s), (0, 0)))
    q, k, v = qkv[0], qkv[1], qkv[2]

    kv_tile = _pick_tile(s_pad, _LANE_TILES)
    bh = batch * num_heads
    grid = (bh, s_pad // kv_tile)

    out = pl.pallas_call(
        functools.partial(_flash_attn_kernel, scale=scale, seq_len=s,
                          kv_tile=kv_tile),
        grid=grid,
        in_specs=[
            pl.BlockSpec((1, s_pad, dh), lambda b, kv: (b, 0, 0)),
            pl.BlockSpec((1, kv_tile, dh), lambda b, kv: (b, kv, 0)),
            pl.BlockSpec((1, kv_tile, dh), lambda b, kv: (b, kv, 0)),
        ],
        out_specs=pl.BlockSpec((1, s_pad, dh), lambda b, kv: (b, 0, 0)),
        out_shape=jax.ShapeDtypeStruct((bh, s_pad, dh), q.dtype),
        scratch_shapes=[pltpu.VMEM((s_pad, dh), jnp.bfloat16),
                        pltpu.VMEM((s_pad, 1), jnp.float32),
                        pltpu.VMEM((s_pad, 1), jnp.float32),
                        pltpu.VMEM((s_pad, dh), jnp.float32)],
        compiler_params=pltpu.CompilerParams(
            dimension_semantics=("parallel", "arbitrary"),
            vmem_limit_bytes=_vmem_limit()),
        cost_estimate=pl.CostEstimate(
            flops=4 * bh * s_pad * s_pad * dh,
            transcendentals=bh * s_pad * s_pad,
            bytes_accessed=2 * bh * s_pad * dh * 4),
    )(q, k, v)

    out = out[:, :s, :].reshape(batch, num_heads, s, dh)
    out = jnp.transpose(out, (0, 2, 1, 3)).reshape(batch * s, d)
    return out


# ------------------------------- forward -------------------------------------

def vivit_mlp_forward(videos, params, cfg):
    B, T, C, H, W = videos.shape
    p, tt, D, Hh = cfg["patch"], cfg["tubelet"], cfg["embed"], cfg["heads"]

    # --- tubelet (Conv3d kernel==stride) patch embedding ---
    x = videos.astype(_ACT_DTYPE)
    x = jnp.transpose(x, (0, 2, 1, 3, 4))                         # [B,C,T,H,W]
    x = x.reshape(B, C, T // tt, tt, H // p, p, W // p, p)
    x = jnp.transpose(x, (0, 2, 4, 6, 1, 3, 5, 7))
    Np = (T // tt) * (H // p) * (W // p)
    x = x.reshape(B * Np, C * tt * p * p)
    x = linear(x, params["patch_w"], params["patch_b"])           # [B*Np, D]
    x = x.reshape(B, Np, D)

    # --- cls token + positional embedding ---
    cls = jnp.broadcast_to(params["cls"], (B, 1, D))
    x = jnp.concatenate([cls, x], axis=1) + params["pos"]         # [B, S, D]
    S = Np + 1

    # --- transformer encoder (joint spatio-temporal attention) ---
    for blk in params["blocks"]:
        xf = x.reshape(B * S, D)
        # LN1 -> QKV projection (fused, LN cached across N tiles)
        qkv = ln_linear(xf, blk["ln1_g"], blk["ln1_b"],
                        blk["qkv_w"], blk["qkv_b"])               # [B*S, 3D]
        # flash-style MHSA, heads in the grid
        o = attention(qkv, B, Hh)                                 # [B*S, D]
        # output projection + residual (fused)
        xf = linear(o, blk["proj_w"], blk["proj_b"], residual=xf)
        # LN2 -> fc1 -> GELU -> fc2 -> +residual (fused, hid-chunked)
        xf = mlp_block(xf, blk["ln2_g"], blk["ln2_b"],
                       blk["fc1_w"], blk["fc1_b"],
                       blk["fc2_w"], blk["fc2_b"])
        x = xf.reshape(B, S, D)

    # --- final LayerNorm + self.mlp head on the cls token ---
    # LayerNorm is per-token, so applying it only to the cls row is exact.
    feats = x[:, 0, :]                                            # [B, D]
    out = ln_linear(feats, params["lnf_g"], params["lnf_b"],
                    params["head_w"], params["head_b"])           # [B, mlp_nodes]
    return out


# ----------------------------- parameter init --------------------------------

def init_params(key, cfg):
    p, tt, D = cfg["patch"], cfg["tubelet"], cfg["embed"]
    C, depth = cfg["channels"], cfg["depth"]
    hid, out = cfg["mlp_hidden"], cfg["mlp_nodes"]
    S = cfg["num_tokens"]
    cin = C * tt * p * p

    def nrm(k, shape, scale=0.02):
        return (scale * jax.random.normal(k, shape, dtype=jnp.float32)
                ).astype(_ACT_DTYPE)

    keys = jax.random.split(key, 6 + depth)
    params = {
        "patch_w": nrm(keys[0], (cin, D)),
        "patch_b": jnp.zeros((D,), jnp.float32),
        "cls": nrm(keys[1], (1, 1, D)),
        "pos": nrm(keys[2], (1, S, D)),
        "lnf_g": jnp.ones((D,), jnp.float32),
        "lnf_b": jnp.zeros((D,), jnp.float32),
        "head_w": nrm(keys[3], (D, out)),
        "head_b": jnp.zeros((out,), jnp.float32),
        "blocks": [],
    }
    for i in range(depth):
        bk = jax.random.split(keys[6 + i], 4)
        params["blocks"].append({
            "ln1_g": jnp.ones((D,), jnp.float32), "ln1_b": jnp.zeros((D,), jnp.float32),
            "qkv_w": nrm(bk[0], (D, 3 * D)), "qkv_b": jnp.zeros((3 * D,), jnp.float32),
            "proj_w": nrm(bk[1], (D, D)), "proj_b": jnp.zeros((D,), jnp.float32),
            "ln2_g": jnp.ones((D,), jnp.float32), "ln2_b": jnp.zeros((D,), jnp.float32),
            "fc1_w": nrm(bk[2], (D, hid)), "fc1_b": jnp.zeros((hid,), jnp.float32),
            "fc2_w": nrm(bk[3], (hid, D)), "fc2_b": jnp.zeros((D,), jnp.float32),
        })
    return params


# --------------------------------- main ---------------------------------------

if __name__ == "__main__":
    # TODO(synk): pretrained checkpoint load (`vivit_ckpt`) and the torchvision
    # data_transform (Resize/CenterCrop/Normalize in process_video) are outside
    # the forward pass and are not reproduced; weights are synthetic.
    B, T, C, H, W = 2, 4, 3, 16, 16
    cfg = dict(
        patch=8, tubelet=2, channels=C, embed=32, heads=4, depth=2,
        mlp_hidden=64, mlp_nodes=16,
    )
    cfg["num_tokens"] = (T // cfg["tubelet"]) * (H // cfg["patch"]) * (W // cfg["patch"]) + 1

    key = jax.random.PRNGKey(0)
    k_data, k_param = jax.random.split(key)
    videos = jax.random.normal(k_data, (B, T, C, H, W), dtype=jnp.float32)
    params = init_params(k_param, cfg)

    out = vivit_mlp_forward(videos, params, cfg)
    out = jax.block_until_ready(out)
    assert out.shape == (B, cfg["mlp_nodes"]), out.shape
    print("KERNEL_OK")
</pallas_src>

<mosaic_0001>
module attributes {stable_mosaic.version = 11 : i64} {
  func.func @_probe_copy_kernel(%arg0: i32, %arg1: memref<8x128xf32, #tpu.memory_space<vmem>>, %arg2: memref<8x128xf32, #tpu.memory_space<vmem>>) attributes {dimension_semantics = [#tpu.dimension_semantics<arbitrary>], iteration_bounds = array<i64: 1>, scalar_prefetch = 0 : i64, scratch_operands = 0 : i64, tpu.core_type = #tpu.core_type<tc>, window_params = [{pipeline_mode = #tpu.pipeline_mode<synchronous>, transform_indices = @transform_0, window_bounds = array<i64: 8, 128>}, {pipeline_mode = #tpu.pipeline_mode<synchronous>, transform_indices = @transform_1, window_bounds = array<i64: 8, 128>}]} {
    %c0 = arith.constant 0 : index
    %c0_0 = arith.constant 0 : index
    %0 = vector.load %arg1[%c0, %c0_0] : memref<8x128xf32, #tpu.memory_space<vmem>>, vector<8x128xf32>
    %c0_1 = arith.constant 0 : index
    %c0_2 = arith.constant 0 : index
    %1 = vector.load %arg2[%c0_1, %c0_2] : memref<8x128xf32, #tpu.memory_space<vmem>>, vector<8x128xf32>
    tpu.vector_store %arg2[%c0_1, %c0_2], %0 {strides = array<i32>} : memref<8x128xf32, #tpu.memory_space<vmem>>, vector<8x128xf32>,
    return
  }
  func.func @transform_0(%arg0: i32) -> (i32, i32) {
    %c0_i32 = arith.constant 0 : i32
    %c0_i32_0 = arith.constant 0 : i32
    %c0_i32_1 = arith.constant 0 : i32
    return %c0_i32, %c0_i32_0 : i32, i32
  }
  func.func @transform_1(%arg0: i32) -> (i32, i32) {
    %c0_i32 = arith.constant 0 : i32
    %c0_i32_0 = arith.constant 0 : i32
    %c0_i32_1 = arith.constant 0 : i32
    return %c0_i32, %c0_i32_0 : i32, i32
  }
}

module attributes {stable_mosaic.version = 11 : i64} {
  func.func @_linear_kernel(%arg0: i32, %arg1: i32, %arg2: i32, %arg3: memref<16x128xbf16, #tpu.memory_space<vmem>>, %arg4: memref<128x32xbf16, #tpu.memory_space<vmem>>, %arg5: memref<1x32xf32, #tpu.memory_space<vmem>>, %arg6: memref<16x32xbf16, #tpu.memory_space<vmem>>, %arg7: memref<16x32xf32, #tpu.memory_space<vmem>>) attributes {dimension_semantics = [#tpu.dimension_semantics<parallel>, #tpu.dimension_semantics<parallel>, #tpu.dimension_semantics<arbitrary>], iteration_bounds = array<i64: 1, 1, 3>, scalar_prefetch = 0 : i64, scratch_operands = 1 : i64, tpu.core_type = #tpu.core_type<tc>, window_params = [{transform_indices = @transform_0, window_bounds = array<i64: 16, 128>}, {transform_indices = @transform_1, window_bounds = array<i64: 128, 32>}, {transform_indices = @transform_2, window_bounds = array<i64: 1, 32>}, {transform_indices = @transform_3, window_bounds = array<i64: 16, 32>}]} {
    %c0_i32 = arith.constant 0 : i32
    %0 = arith.cmpi eq, %arg2, %c0_i32 : i32
    %1 = arith.extui %0 : i1 to i32
    %c0_i32_0 = arith.constant 0 : i32
    %2 = arith.cmpi ne, %1, %c0_i32_0 : i32
    scf.if %2 {
      %cst_9 = arith.constant 0.000000e+00 : f32
      %12 = vector.broadcast %cst_9 : f32 to vector<16x32xf32>
      %c0_10 = arith.constant 0 : index
      %c0_11 = arith.constant 0 : index
      %13 = vector.load %arg7[%c0_10, %c0_11] : memref<16x32xf32, #tpu.memory_space<vmem>>, vector<16x32xf32>
      tpu.vector_store %arg7[%c0_10, %c0_11], %12 {strides = array<i32>} : memref<16x32xf32, #tpu.memory_space<vmem>>, vector<16x32xf32>,
    } else {
    }
    %c0 = arith.constant 0 : index
    %c0_1 = arith.constant 0 : index
    %3 = vector.load %arg7[%c0, %c0_1] : memref<16x32xf32, #tpu.memory_space<vmem>>, vector<16x32xf32>
    %c0_2 = arith.constant 0 : index
    %c0_3 = arith.constant 0 : index
    %4 = vector.load %arg3[%c0_2, %c0_3] : memref<16x128xbf16, #tpu.memory_space<vmem>>, vector<16x128xbf16>
    %c0_4 = arith.constant 0 : index
    %c0_5 = arith.constant 0 : index
    %5 = vector.load %arg4[%c0_4, %c0_5] : memref<128x32xbf16, #tpu.memory_space<vmem>>, vector<128x32xbf16>
    %cst = arith.constant dense<0.000000e+00> : vector<16x32xf32>
    %6 = tpu.matmul %4, %5, %cst {dimension_numbers = #tpu.dot_dimension_numbers<[1], [0], [0], [1], [0, 0, 1, 1], [], []>} : vector<16x128xbf16>, vector<128x32xbf16>, vector<16x32xf32> -> vector<16x32xf32>
    %7 = arith.addf %3, %6 : vector<16x32xf32>
    %c0_6 = arith.constant 0 : index
    %c0_7 = arith.constant 0 : index
    %8 = vector.load %arg7[%c0_6, %c0_7] : memref<16x32xf32, #tpu.memory_space<vmem>>, vector<16x32xf32>
    tpu.vector_store %arg7[%c0_6, %c0_7], %7 {strides = array<i32>} : memref<16x32xf32, #tpu.memory_space<vmem>>, vector<16x32xf32>,
    %c2_i32 = arith.constant 2 : i32
    %9 = arith.cmpi eq, %arg2, %c2_i32 : i32
    %10 = arith.extui %9 : i1 to i32
    %c0_i32_8 = arith.constant 0 : i32
    %11 = arith.cmpi ne, %10, %c0_i32_8 : i32
    scf.if %11 {
      %c0_9 = arith.constant 0 : index
      %c0_10 = arith.constant 0 : index
      %12 = vector.load %arg7[%c0_9, %c0_10] : memref<16x32xf32, #tpu.memory_space<vmem>>, vector<16x32xf32>
      %c0_11 = arith.constant 0 : index
      %c0_12 = arith.constant 0 : index
      %13 = vector.load %arg5[%c0_11, %c0_12] : memref<1x32xf32, #tpu.memory_space<vmem>>, vector<1x32xf32>
      %14 = vector.broadcast %13 : vector<1x32xf32> to vector<16x32xf32>
      %15 = arith.addf %12, %14 : vector<16x32xf32>
      %16 = arith.truncf %15 : vector<16x32xf32> to vector<16x32xbf16>
      %c0_13 = arith.constant 0 : index
      %c0_14 = arith.constant 0 : index
      %17 = vector.load %arg6[%c0_13, %c0_14] : memref<16x32xbf16, #tpu.memory_space<vmem>>, vector<16x32xbf16>
      tpu.vector_store %arg6[%c0_13, %c0_14], %16 {strides = array<i32>} : memref<16x32xbf16, #tpu.memory_space<vmem>>, vector<16x32xbf16>,
    } else {
    }
    return
  }
  func.func @transform_0(%arg0: i32, %arg1: i32, %arg2: i32) -> (i32, i32) {
    %c0_i32 = arith.constant 0 : i32
    return %arg0, %arg2 : i32, i32
  }
  func.func @transform_1(%arg0: i32, %arg1: i32, %arg2: i32) -> (i32, i32) {
    %c0_i32 = arith.constant 0 : i32
    return %arg2, %arg1 : i32, i32
  }
  func.func @transform_2(%arg0: i32, %arg1: i32, %arg2: i32) -> (i32, i32) {
    %c0_i32 = arith.constant 0 : i32
    %c0_i32_0 = arith.constant 0 : i32
    return %c0_i32, %arg1 : i32, i32
  }
  func.func @transform_3(%arg0: i32, %arg1: i32, %arg2: i32) -> (i32, i32) {
    %c0_i32 = arith.constant 0 : i32
    return %arg0, %arg1 : i32, i32
  }
}

</mosaic_0001>

<bundles_post_ra>
// kernel: tpu_custom_call.1
= control target key start
LH: loop header
LB: loop body
LE: loop exit
PB: predicated region body
PF: predicated region fallthrough
CT: control target
= control target key end

     0   :  { %6 = vsyncpa [#allocation3], 0  ;;  %s102_s0 = inlined_call_operand.hbm [shape: f32[8,128], index: 0, kind: input, shape index: {}]   ;;  %s103_s1 = inlined_call_operand.hbm [shape: f32[8,128], index: 1, kind: output, shape index: {}]  }
   0x1   :  { %7 = vsyncpa [#allocation4], 0  ;;  %s84_s6 = smov [#allocation2]  }
   0x2   :  { %s14_s7 = sshll.u32 %s84_s6, 4  ;;  %s15_s7 = int_to_ptr.vmem [resolvable:$true] %s14_s7 }
   0x3   :  { %s48_s8 = scalar_lea.vmem %s15_s7, 128  ;;  %p53_p1 = scmp.lt.s32.totalorder %s15_s7, %s15_s7 }
   0x4   :  { %p49_p0 = scmp.ne.s32.totalorder %s15_s7, %s48_s8  ;;  %p54_p2 = scmp.lt.s32.totalorder %s48_s8, %s48_s8 }
   0x6   :  { %p55_p3 = por %p54_p2, %p53_p1 }
   0x8   :  { %p56_p4 = pnand %p55_p3, %p49_p0 }
   0xa   :  { %59 = shalt.err (!%p56_p4)
}
   0xb   :  { %17 = dma.hbm_to_vmem [thread:$0]  %s102_s0, 128, %s15_s7, [#allocation3]  }
   0xc   :  { %80 = dma.done.wait [#allocation3], 128  }
   0xd   :  { %81 = vsyncadd [#allocation3], 4294967168  ;;  %s85_s11 = smov [#allocation5]   ;;  %v21_v0 = vld [vmem:[#allocation2] sm:$0xff] }
   0xe   :  { %s29_s12 = sshll.u32 %s85_s11, 4  ;;  %22 = vst [vmem:[#allocation5] sm:$0xff] %v21_v0  ;;  %s30_s12 = int_to_ptr.vmem [resolvable:$true] %s29_s12 }
   0xf   :  { %s60_s13 = scalar_lea.vmem %s30_s12, 128  ;;  %p65_p6 = scmp.lt.s32.totalorder %s30_s12, %s30_s12 }
  0x10   :  { %p61_p5 = scmp.ne.s32.totalorder %s30_s12, %s60_s13  ;;  %p66_p7 = scmp.lt.s32.totalorder %s60_s13, %s60_s13 }
  0x12   :  { %p67_p8 = por %p66_p7, %p65_p6 }
  0x14   :  { %p68_p9 = pnand %p67_p8, %p61_p5 }
  0x16   :  { %71 = shalt.err (!%p68_p9)
}
  0x17   :  { %32 = dma.vmem_to_hbm [thread:$0]  %s30_s12, 128, %s103_s1, [#allocation4]  }
  0x18   :  { %82 = dma.done.wait [#allocation4], 128  }
  0x19   :  { %83 = vsyncadd [#allocation4], 4294967168 }
  0x1a   :  { %36 = vsyncpa [#allocation3], 1 }
  0x1b   :  { %37 = vsyncpa [#allocation4], 1 }

// kernel: tpu_custom_call.1
= control target key start
LH: loop header
LB: loop body
LE: loop exit
PB: predicated region body
PF: predicated region fallthrough
CT: control target
= control target key end

     0   :  { %8 = vsyncpa [#allocation5], 0  ;;  %s755_s12 = smov 0   ;;  %s757_s13 = smov 0   ;;  %s858_s0 = inlined_call_operand.vmem [shape: bf16[16,384], index: 0, kind: input, shape index: {}]   ;;  %s859_s1 = inlined_call_operand.vmem [shape: bf16[384,32], index: 1, kind: input, shape index: {}]   ;;  %s860_s2 = inlined_call_operand.vmem [shape: f32[1,32], index: 2, kind: input, shape index: {}]   ;;  %s861_s3 = inlined_call_operand.hbm [shape: bf16[16,32], index: 3, kind: output, shape index: {}]  }
   0x1   :  { %s759_s14 = smov 0   ;;  %s761_s15 = smov 0  }
   0x2   :  { %s763_s16 = smov 0  }
   0x3 LB: > { %s541_s17 = sadd.s32 4294967295, %s727_s16   ;;  %s26_s18 = sadd.s32 1, %s723_s15  ;;  %s727_s16 = sphi %s763_s16, %s14_s16   ;;  %s723_s15 = sphi %s761_s15, %s866_s15   ;;  %s719_s14 = sphi %s759_s14, %s865_s14   ;;  %s715_s13 = sphi %s757_s13, %s864_s13   ;;  %s711_s12 = sphi %s755_s12, %s863_s12  }
   0x4   : > { %p27_p0 = scmp.ge.s32.totalorder %s26_s18, 3  ;;  %p49_p1 = scmp.ne.s32.totalorder %s715_s13, %s711_s12 }
   0x5   : > { %p50_p2 = scmp.eq.s32.totalorder %s727_s16, 0  ;;  %s42_s20 = sadd.s32 1, %s715_s13 }
   0x6   : > { %s868_s18 = smov (%p27_p0, %s26_s18), 0  ;;  %p544_p5 = scmp.ge.s32.totalorder %s727_s16, 3 }
   0x7   : > { %p51_p3 = por %p50_p2, %p49_p1  ;;  %s38_s19 = ssub.s32 %s723_s15, %s868_s18 }
   0x8   : > { %p40_p4 = scmp.eq.s32.totalorder %s38_s19, 0  ;;  %163 = sbr.rel (%p544_p5) target bundleno = 18 (0x12), region = 20 }
   0xa   : > { %s791_s21 = scalar_select %p40_p4, %s715_s13, %s42_s20  }
   0xd   : > { %166 = sbr.rel (!%p51_p3) target bundleno = 18 (0x12), region = 24  ;;  %s168_s22 = sand.u32 (%p51_p3), 1, %s715_s13  }
   0xe   : > { %s546_s23 = sshll.u32 (%p51_p3), %s723_s15, 2  ;;  %s545_s24 = sshll.u32 (%p51_p3), %s168_s22, 3 }
   0xf   : > { %s175_s27 = scalar_lea.vmem (%p51_p3), %s858_s0, %s546_s23  ;;  %s170_s28 = scalar_lea.vmem (%p51_p3), [#allocation3], %s545_s24 }
  0x10   : > { %v192_v0 = vld [vmem:[%s175_s27] sm:$0xf] (%p51_p3)  ;;  %v194_v1 = vld [vmem:[%s175_s27 + $0xc] sm:$0xf] (%p51_p3) }
  0x11   : > { %193 = vst [vmem:[%s170_s28] sm:$0xf] (%p51_p3), %v192_v0  ;;  %195 = vst [vmem:[%s170_s28 + $0x4] sm:$0xf] (%p51_p3), %v194_v1 }
  0x12 PF: > { %p547_p6 = scmp.ge.s32.totalorder %s727_s16, 1  ;;  %p234_p7 = scmp.lt.s32.totalorder %s727_s16, 4 }
  0x14   : > { %p235_p8 = pnand %p547_p6, %p234_p7 }
  0x15   : > { %s241_s29 = sand.u32 (!%p235_p8), 1, %s711_s12   ;;  %s549_s30 = sshll.u32 (!%p235_p8), %s719_s14, 4 }
  0x16   : > { %238 = sbr.rel (%p235_p8) target bundleno = 295 (0x127), region = 69  ;;  %s803_s4 = sshll.u32 (!%p235_p8), %s241_s29, 3 }
  0x17   : > { %p272_p9 = scmp.lt.s32.totalorder (!%p235_p8), %s549_s30, 47  ;;  %s243_s9 = scalar_lea.vmem (!%p235_p8), [#allocation3], %s803_s4 }
  0x18   : > { %p551_p10 = scmp.ne.s32.totalorder (!%p235_p8), %s719_s14, 0 }
  0x1b   : > { %s870_s30 = smov (!%p272_p9, %s549_s30), 47  ;;  %288 = sbr.rel (%p551_p10) target bundleno = 34 (0x22), region = 77 }
  0x1c   : > { %s550_s5 = sshll.u32 %s870_s30, 2 }
  0x1d   : > { %s808_s8 = scalar_lea.vmem %s859_s1, %s550_s5 }
  0x20   : > { %vm289_vm0 = vcmask 261120   ;;  %v729_v2 = vmov 0.0  }
  0x21   : > { %290 = vst.msk [vmem:[#allocation2] sm:$0xff] %vm289_vm0, %v729_v2  ;;  %291 = vst.msk [vmem:[#allocation2 + $0x8] sm:$0xff] %vm289_vm0, %v729_v2 }
  0x22 PF: > { %v652_v3 = vld [vmem:[%s808_s8 + $0x38] sm:$0xff]   ;;  %v730_v4 = vmov 0.0   ;;  %v653_v5 = vld [vmem:[%s808_s8 + $0x30] sm:$0xff]   ;;  %vm731_vm1 = vmmov 0   ;;  %v654_v6 = vld [vmem:[%s808_s8 + $0x28] sm:$0xff]   ;;  %vm409_vm2 = vcmask 261120  }
  0x23   : > { %580 = vmatprep.subr.bf16.mxu0 %v730_v4  ;;  %596 = vmatprep.mubr.msk.bf16.mxu0 %vm731_vm1, %v730_v4  ;;  %v655_v7 = vld [vmem:[%s808_s8 + $0x20] sm:$0xff]   ;;  %v656_v8 = vld [vmem:[%s808_s8 + $0x18] sm:$0xff]   ;;  %v657_v9 = vld [vmem:[%s808_s8 + $0x10] sm:$0xff]   ;;  %p561_p11 = scmp.ne.s32.totalorder %s719_s14, 2 }
  0x24   : > { %581 = vmatpush3.bf16.msra.mxu0 %v652_v3  ;;  %v658_v10 = vld [vmem:[%s808_s8 + $0x8] sm:$0xff]   ;;  %v659_v11 = vld [vmem:[%s808_s8] sm:$0xff]   ;;  %v660_v12 = vld [vmem:[%s243_s9] sm:$0xff]  }
  0x25   : > { %582 = vmatprep.subr.bf16.mxu0 %v730_v4 }
  0x28   : > { %583 = vmatpush3.bf16.msra.mxu0 %v653_v5  ;;  %v292_v13 = vld [vmem:[#allocation2] sm:$0xff]  ;;  %v293_v17 = vld [vmem:[#allocation2 + $0x8] sm:$0xff] }
  0x29   : > { %584 = vmatprep.subr.bf16.mxu0 %v730_v4 }
  0x2c   : > { %585 = vmatpush3.bf16.msra.mxu0 %v654_v6 }
  0x2d   : > { %586 = vmatprep.subr.bf16.mxu0 %v730_v4 }
  0x30   : > { %587 = vmatpush3.bf16.msra.mxu0 %v655_v7 }
  0x31   : > { %588 = vmatprep.subr.bf16.mxu0 %v730_v4 }
  0x34   : > { %589 = vmatpush3.bf16.msra.mxu0 %v656_v8 }
  0x35   : > { %590 = vmatprep.subr.bf16.mxu0 %v730_v4 }
  0x38   : > { %591 = vmatpush3.bf16.msra.mxu0 %v657_v9 }
  0x39   : > { %592 = vmatprep.subr.bf16.mxu0 %v730_v4 }
  0x3c   : > { %593 = vmatpush3.bf16.msra.mxu0 %v658_v10 }
  0x3d   : > { %594 = vmatprep.subr.bf16.mxu0 %v730_v4 }
  0x40   : > { %595 = vmatpush3.bf16.msra.mxu0 %v659_v11 }
  0x43   : > { %597 = vmatmul.mubr.bf16.vlgmr.msra.gmra.mxu0 %v660_v12 }
 0x103   : > { %v400_v14 = vpop.f32.mrf.mxu0 }
 0x104   : > { %v407_v15 = vadd.f32 %v400_v14, %v292_v13 }
 0x105   : > { %v598_v16 = vpop.f32.mrf.mxu0 }
 0x106   : > { %410 = vst.msk [vmem:[#allocation2] sm:$0xff] %vm409_vm2, %v407_v15  ;;  %415 = sbr.rel (%p561_p11) target bundleno = 279 (0x117), region = 81 }
 0x107   : > { %v403_v18 = vpop.f32.mrf.mxu0 }
 0x108   : > { %v408_v19 = vadd.f32 %v403_v18, %v293_v17 }
 0x109   : > { %v599_v20 = vpop.f32.mrf.mxu0 }
 0x10a   : > { %411 = vst.msk [vmem:[#allocation2 + $0x8] sm:$0xff] %vm409_vm2, %v408_v19 }
 0x10b   : > { %v562_v22 = vld [vmem:[%s860_s2] ss:$0 sm:$0xff]  ;;  %vm435_vm3 = vcmask 257024  }
 0x10d   : > { %v416_v21 = vld [vmem:[#allocation2] sm:$0xff] }
 0x10e   : > { %v425_v24 = vadd.f32 %v562_v22, %v416_v21 }
 0x110   : > { %v569_v26 = vpack.c.bf16 %v425_v24, %v425_v24 }
 0x111   : > { %v417_v23 = vld [vmem:[#allocation2 + $0x8] sm:$0xff] }
 0x112   : > { %v426_v25 = vadd.f32 %v562_v22, %v417_v23  ;;  %436 = vst.msk [vmem:[#allocation4] sm:$0xf] %vm435_vm3, %v569_v26 }
 0x114   : > { %v570_v27 = vpack.c.bf16 %v426_v25, %v426_v25 }
 0x116   : > { %437 = vst.msk [vmem:[#allocation4 + $0x4] sm:$0xf] %vm435_vm3, %v570_v27 }
 0x117 PF: > { %p828_p12 = scmp.eq.s32.totalorder %s541_s17, 2  ;;  %s732_s14 = smov [#allocation4]  }
 0x118   : > { %s448_s19 = sshll.u32 %s732_s14, 4  ;;  %s449_s19 = int_to_ptr.vmem [resolvable:$true] %s448_s19 }
 0x119   : > { %s661_s20 = scalar_lea.vmem %s449_s19, 128  ;;  %p668_p2 = scmp.lt.s32.totalorder %s449_s19, %s449_s19 }
 0x11a   : > { %p662_p13 = scmp.ne.s32.totalorder %s449_s19, %s661_s20  ;;  %p669_p3 = scmp.lt.s32.totalorder %s661_s20, %s661_s20 }
 0x11c   : > { %p663_p0 = pnand %p662_p13, %p828_p12  ;;  %p670_p4 = por %p669_p3, %p668_p2 }
 0x11e   : > { %p664_p1 = pneg %p663_p0 }
 0x120   : > { %p671_p5 = pnand %p670_p4, %p664_p1 }
 0x122   : > { %674 = shalt.err (!%p671_p5)
}
 0x123   : > { %s733_s22 = smov 64   ;;  %s734_s17 = smov 4  }
 0x124   : > { %601 = dma.vmem_to_hbm [thread:$0]  (%p828_p12), %s449_s19, 128, %s861_s3, [#allocation5], %s733_s22, %s733_s22, %s734_s17  }
 0x125   : > { %706 = dma.done.wait (%p828_p12), [#allocation5], 128  }
 0x126   : > { %708 = vsyncadd (%p828_p12), [#allocation5], 4294967168 }
 0x127 PF: > { %s14_s16 = sadd.s32 1, %s727_s16   ;;  %s863_s12 = smov %s715_s13 }
 0x128   : > { %p11_p6 = scmp.ge.s32.totalorder %s14_s16, 5   ;;  %s864_s13 = smov %s791_s21 }
 0x129   : > { %s865_s14 = smov %s723_s15  ;;  %s866_s15 = smov %s868_s18 }
 0x12a   :  { %13 = sbr.rel (!%p11_p6) target bundleno = 3 (0x3), region = 120 }
 0x12f   :  { %464 = vsyncpa [#allocation5], 1 }
 0x130   :  { %466 = vsyncpa [#allocation5 + $0x1], 1 }

</bundles_post_ra>
